<compile_context>
chip_gen: v7x
topology: tpu7x:2x2x1
jax: 0.10.0
libtpu: 0.0.40
codegen_flags: <defaults>
</compile_context>

<pallas_src>
import functools

import numpy as np
import jax
import jax.numpy as jnp
from jax.experimental import pallas as pl
from jax.experimental.pallas import tpu as pltpu

_LANES = 128
_SUBLANES = 8
_MAX_TILE_ROWS = 512          # 512x128 f32 = 256 KiB / tile  (~85% HBM roofline)


def _round_up(a, b):
    return -(-a // b) * b


# --------------------------------------------------------------------------- #
# Phase 1: streaming statistics -> scalar threshold th
# --------------------------------------------------------------------------- #
def _stats_kernel(mini, maxi, n, n_tiles, tile_rows,
                  c_ref, psd_ref, th_ref, acc_s_ref, acc_q_ref, shift_ref):
    t = pl.program_id(0)

    @pl.when(t == 0)
    def _init():
        # Coarse center (first PSD element, always valid) -> numerically stable
        # shifted single-pass variance.
        shift_ref[...] = psd_ref[0:1, 0:1]
        acc_s_ref[...] = jnp.zeros_like(acc_s_ref)
        acc_q_ref[...] = jnp.zeros_like(acc_q_ref)

    x = psd_ref[...]                         # (tile_rows, 128) f32
    d = x - shift_ref[...]                   # broadcast (1,1)

    groups = tile_rows // _SUBLANES

    def _accumulate(dd):
        # (tile_rows,128) -> (groups,8,128): layout-preserving; reducing axis 0
        # is elementwise VALU adds across vregs (no per-row XLU reductions).
        d3 = dd.reshape(groups, _SUBLANES, _LANES)
        acc_s_ref[...] += jnp.sum(d3, axis=0)
        acc_q_ref[...] += jnp.sum(d3 * d3, axis=0)

    tile_elems = tile_rows * _LANES
    tail_valid = n - (n_tiles - 1) * tile_elems   # valid elements in last tile

    if tail_valid == tile_elems:
        # Every tile (incl. the last) is completely valid: no masking anywhere.
        _accumulate(d)
    else:
        is_tail = t == n_tiles - 1

        @pl.when(jnp.logical_not(is_tail))
        def _full_tile():
            _accumulate(d)

        @pl.when(is_tail)
        def _partial_tile():
            row = jax.lax.broadcasted_iota(jnp.int32, (tile_rows, _LANES), 0)
            lane = jax.lax.broadcasted_iota(jnp.int32, (tile_rows, _LANES), 1)
            valid = row * _LANES + lane < tail_valid
            _accumulate(jnp.where(valid, d, 0.0))

    @pl.when(t == n_tiles - 1)
    def _finalize():
        s = jnp.sum(acc_s_ref[...], keepdims=True)     # (1,1)  Σ(x - shift)
        q = jnp.sum(acc_q_ref[...], keepdims=True)     # (1,1)  Σ(x - shift)²
        inv_n = jnp.float32(1.0 / n)
        inv_nm1 = jnp.float32(1.0 / max(n - 1, 1))     # torch std(): ddof=1
        mean = shift_ref[...] + s * inv_n
        var = (q - s * s * inv_n) * inv_nm1
        std = jnp.sqrt(jnp.maximum(var, 0.0))
        c = jnp.clip(c_ref[0, 0], mini, maxi)          # scalar path (SMEM)
        th_ref[...] = jnp.maximum(mean + c * std, 0.0)


# --------------------------------------------------------------------------- #
# Phase 2: mask write  (out = 1.0 where PSD > th else 0.0)
# --------------------------------------------------------------------------- #
def _mask_kernel(th_ref, psd_ref, out_ref):
    th = th_ref[0, 0]                                   # SMEM scalar, broadcast
    out_ref[...] = jnp.where(psd_ref[...] > th, 1.0, 0.0).astype(out_ref.dtype)


# --------------------------------------------------------------------------- #
# Wrapper
# --------------------------------------------------------------------------- #
@functools.partial(jax.jit, static_argnames=("minmax", "out_dtype"))
def fftnn_forward(psd, c, *, minmax=(-5.0, 5.0), out_dtype=jnp.float32):
    """psd: any-shape tensor. Returns a same-shape binary mask (torch semantics)."""
    psd = jnp.asarray(psd, jnp.float32)
    orig_shape = psd.shape
    n = int(psd.size)

    rows = _round_up(max(n, 1), _LANES) // _LANES
    rows_pad = _round_up(rows, _SUBLANES)
    padded = rows_pad * _LANES

    flat = psd.reshape(-1)
    if padded != n:
        # alignment pad (fused under jit); metadata-only when n % 1024 == 0
        flat = jnp.pad(flat, (0, padded - n))
    x2 = flat.reshape(rows_pad, _LANES)

    tile_rows = min(_MAX_TILE_ROWS, rows_pad)            # multiple of 8
    n_tiles = pl.cdiv(rows_pad, tile_rows)

    c2 = jnp.asarray(c, jnp.float32).reshape(1, 1)

    stats = functools.partial(_stats_kernel, float(minmax[0]), float(minmax[1]),
                              n, n_tiles, tile_rows)
    th = pl.pallas_call(
        stats,
        out_shape=jax.ShapeDtypeStruct((1, 1), jnp.float32),
        grid=(n_tiles,),
        in_specs=[
            pl.BlockSpec(memory_space=pltpu.MemorySpace.SMEM),        # c
            pl.BlockSpec((tile_rows, _LANES), lambda t: (t, 0)),      # PSD tile
        ],
        out_specs=pl.BlockSpec((1, 1), lambda t: (0, 0)),             # resident th
        scratch_shapes=[
            pltpu.VMEM((_SUBLANES, _LANES), jnp.float32),             # Σd partials
            pltpu.VMEM((_SUBLANES, _LANES), jnp.float32),             # Σd² partials
            pltpu.VMEM((1, 1), jnp.float32),                          # shift
        ],
        compiler_params=pltpu.CompilerParams(
            dimension_semantics=("arbitrary",)),
    )(c2, x2)

    out = pl.pallas_call(
        _mask_kernel,
        out_shape=jax.ShapeDtypeStruct((rows_pad, _LANES), out_dtype),
        grid=(n_tiles,),
        in_specs=[
            pl.BlockSpec(memory_space=pltpu.MemorySpace.SMEM),        # th scalar
            pl.BlockSpec((tile_rows, _LANES), lambda t: (t, 0)),      # PSD tile
        ],
        out_specs=pl.BlockSpec((tile_rows, _LANES), lambda t: (t, 0)),
        compiler_params=pltpu.CompilerParams(
            dimension_semantics=("parallel",)),                       # 2-TC on v7x
    )(th, x2)

    out_flat = out.reshape(-1)
    if padded != n:
        out_flat = out_flat[:n]
    return out_flat.reshape(orig_shape)


# --------------------------------------------------------------------------- #
# Pure-numpy mirror of the PyTorch FFTNN.forward
# --------------------------------------------------------------------------- #
def fftnn_reference(psd, c, minmax=(-5.0, 5.0)):
    psd = np.asarray(psd, np.float64)
    m = psd.mean()
    s = psd.std(ddof=1) if psd.size > 1 else 0.0
    cc = float(np.clip(float(np.asarray(c).reshape(-1)[0]), minmax[0], minmax[1]))
    th = max(m + cc * s, 0.0)
    ind = np.maximum(psd - th, 0.0)
    d = np.ones_like(ind)
    d[ind > 0] = ind[ind > 0]
    return (ind / d).astype(np.float32)


if __name__ == "__main__":
    seq_len = 16
    key = jax.random.PRNGKey(0)
    k1, k2 = jax.random.split(key)
    psd = jax.random.uniform(k1, (seq_len,), jnp.float32, 0.0, 4.0)
    c = jax.random.normal(k2, (1,), jnp.float32) * 0.5   # the nn.Parameter 'c'

    out = fftnn_forward(psd, c)
    out = jax.block_until_ready(out)

    ref = fftnn_reference(np.asarray(psd), np.asarray(c))
    assert out.shape == psd.shape and out.dtype == jnp.float32
    np.testing.assert_allclose(np.asarray(out), ref, atol=1e-6)
    print("KERNEL_OK")
</pallas_src>

<mosaic_0001>
module attributes {stable_mosaic.version = 11 : i64} {
  func.func @_mask_kernel(%arg0: i32, %arg1: memref<1x1xf32, #tpu.memory_space<smem>>, %arg2: memref<8x128xf32, #tpu.memory_space<vmem>>, %arg3: memref<8x128xf32, #tpu.memory_space<vmem>>) attributes {dimension_semantics = [#tpu.dimension_semantics<parallel>], iteration_bounds = array<i64: 1>, scalar_prefetch = 0 : i64, scratch_operands = 0 : i64, tpu.core_type = #tpu.core_type<tc>, window_params = [{transform_indices = @transform_0, window_bounds = array<i64: 1, 1>}, {transform_indices = @transform_1, window_bounds = array<i64: 8, 128>}, {transform_indices = @transform_2, window_bounds = array<i64: 8, 128>}]} {
    %c0 = arith.constant 0 : index
    %c0_0 = arith.constant 0 : index
    %0 = memref.load %arg1[%c0, %c0_0] : memref<1x1xf32, #tpu.memory_space<smem>>
    %c0_1 = arith.constant 0 : index
    %c0_2 = arith.constant 0 : index
    %1 = vector.load %arg2[%c0_1, %c0_2] : memref<8x128xf32, #tpu.memory_space<vmem>>, vector<8x128xf32>
    %2 = vector.broadcast %0 : f32 to vector<8x128xf32>
    %3 = arith.cmpf ogt, %1, %2 : vector<8x128xf32>
    %cst = arith.constant 1.000000e+00 : f32
    %cst_3 = arith.constant 0.000000e+00 : f32
    %4 = vector.broadcast %cst : f32 to vector<8x128xf32>
    %5 = vector.broadcast %cst_3 : f32 to vector<8x128xf32>
    %6 = arith.select %3, %4, %5 : vector<8x128xi1>, vector<8x128xf32>
    %c0_4 = arith.constant 0 : index
    %c0_5 = arith.constant 0 : index
    %7 = vector.load %arg3[%c0_4, %c0_5] : memref<8x128xf32, #tpu.memory_space<vmem>>, vector<8x128xf32>
    tpu.vector_store %arg3[%c0_4, %c0_5], %6 {strides = array<i32>} : memref<8x128xf32, #tpu.memory_space<vmem>>, vector<8x128xf32>,
    return
  }
  func.func @transform_0(%arg0: i32) -> (i32, i32) {
    %c0_i32 = arith.constant 0 : i32
    %c0_i32_0 = arith.constant 0 : i32
    %c0_i32_1 = arith.constant 0 : i32
    return %c0_i32, %c0_i32_0 : i32, i32
  }
  func.func @transform_1(%arg0: i32) -> (i32, i32) {
    %c0_i32 = arith.constant 0 : i32
    %c0_i32_0 = arith.constant 0 : i32
    return %arg0, %c0_i32 : i32, i32
  }
  func.func @transform_2(%arg0: i32) -> (i32, i32) {
    %c0_i32 = arith.constant 0 : i32
    %c0_i32_0 = arith.constant 0 : i32
    return %arg0, %c0_i32 : i32, i32
  }
}

module attributes {stable_mosaic.version = 11 : i64} {
  func.func @_stats_kernel(%arg0: i32, %arg1: memref<1x1xf32, #tpu.memory_space<smem>>, %arg2: memref<8x128xf32, #tpu.memory_space<vmem>>, %arg3: memref<1x1xf32, #tpu.memory_space<vmem>>, %arg4: memref<8x128xf32, #tpu.memory_space<vmem>>, %arg5: memref<8x128xf32, #tpu.memory_space<vmem>>, %arg6: memref<1x1xf32, #tpu.memory_space<vmem>>) attributes {dimension_semantics = [#tpu.dimension_semantics<arbitrary>], iteration_bounds = array<i64: 1>, scalar_prefetch = 0 : i64, scratch_operands = 3 : i64, tpu.core_type = #tpu.core_type<tc>, window_params = [{transform_indices = @transform_0, window_bounds = array<i64: 1, 1>}, {transform_indices = @transform_1, window_bounds = array<i64: 8, 128>}, {pipeline_mode = #tpu.pipeline_mode<synchronous>, transform_indices = @transform_2, window_bounds = array<i64: 1, 1>}]} {
    %c0_i32 = arith.constant 0 : i32
    %0 = arith.cmpi eq, %arg0, %c0_i32 : i32
    %1 = arith.extui %0 : i1 to i32
    %c0_i32_0 = arith.constant 0 : i32
    %2 = arith.cmpi ne, %1, %c0_i32_0 : i32
    scf.if %2 {
      %c0_9 = arith.constant 0 : index
      %c0_10 = arith.constant 0 : index
      %16 = vector.load %arg2[%c0_9, %c0_10] : memref<8x128xf32, #tpu.memory_space<vmem>>, vector<1x1xf32>
      %c0_11 = arith.constant 0 : index
      %c0_12 = arith.constant 0 : index
      %17 = vector.load %arg6[%c0_11, %c0_12] : memref<1x1xf32, #tpu.memory_space<vmem>>, vector<1x1xf32>
      tpu.vector_store %arg6[%c0_11, %c0_12], %16 {strides = array<i32>} : memref<1x1xf32, #tpu.memory_space<vmem>>, vector<1x1xf32>,
      %cst = arith.constant 0.000000e+00 : f32
      %18 = vector.broadcast %cst : f32 to vector<8x128xf32>
      %c0_13 = arith.constant 0 : index
      %c0_14 = arith.constant 0 : index
      %19 = vector.load %arg4[%c0_13, %c0_14] : memref<8x128xf32, #tpu.memory_space<vmem>>, vector<8x128xf32>
      tpu.vector_store %arg4[%c0_13, %c0_14], %18 {strides = array<i32>} : memref<8x128xf32, #tpu.memory_space<vmem>>, vector<8x128xf32>,
      %cst_15 = arith.constant 0.000000e+00 : f32
      %20 = vector.broadcast %cst_15 : f32 to vector<8x128xf32>
      %c0_16 = arith.constant 0 : index
      %c0_17 = arith.constant 0 : index
      %21 = vector.load %arg5[%c0_16, %c0_17] : memref<8x128xf32, #tpu.memory_space<vmem>>, vector<8x128xf32>
      tpu.vector_store %arg5[%c0_16, %c0_17], %20 {strides = array<i32>} : memref<8x128xf32, #tpu.memory_space<vmem>>, vector<8x128xf32>,
    } else {
    }
    %c0 = arith.constant 0 : index
    %c0_1 = arith.constant 0 : index
    %3 = vector.load %arg2[%c0, %c0_1] : memref<8x128xf32, #tpu.memory_space<vmem>>, vector<8x128xf32>
    %c0_2 = arith.constant 0 : index
    %c0_3 = arith.constant 0 : index
    %4 = vector.load %arg6[%c0_2, %c0_3] : memref<1x1xf32, #tpu.memory_space<vmem>>, vector<1x1xf32>
    %5 = vector.broadcast %4 : vector<1x1xf32> to vector<8x128xf32>
    %6 = arith.subf %3, %5 : vector<8x128xf32>
    %c0_i32_4 = arith.constant 0 : i32
    %7 = arith.cmpi eq, %arg0, %c0_i32_4 : i32
    %true = arith.constant true
    %8 = arith.xori %7, %true : i1
    %9 = arith.extui %8 : i1 to i32
    %c0_i32_5 = arith.constant 0 : i32
    %10 = arith.cmpi ne, %9, %c0_i32_5 : i32
    scf.if %10 {
      %16 = vector.shape_cast %6 : vector<8x128xf32> to vector<1x8x128xf32>
      %c0_9 = arith.constant 0 : index
      %c0_10 = arith.constant 0 : index
      %17 = vector.load %arg4[%c0_9, %c0_10] : memref<8x128xf32, #tpu.memory_space<vmem>>, vector<8x128xf32>
      %cst = arith.constant dense<0.000000e+00> : vector<8x128xf32>
      %18 = vector.multi_reduction <add>, %16, %cst [0] : vector<1x8x128xf32> to vector<8x128xf32>
      %19 = arith.addf %17, %18 : vector<8x128xf32>
      %c0_11 = arith.constant 0 : index
      %c0_12 = arith.constant 0 : index
      %20 = vector.load %arg4[%c0_11, %c0_12] : memref<8x128xf32, #tpu.memory_space<vmem>>, vector<8x128xf32>
      tpu.vector_store %arg4[%c0_11, %c0_12], %19 {strides = array<i32>} : memref<8x128xf32, #tpu.memory_space<vmem>>, vector<8x128xf32>,
      %c0_13 = arith.constant 0 : index
      %c0_14 = arith.constant 0 : index
      %21 = vector.load %arg5[%c0_13, %c0_14] : memref<8x128xf32, #tpu.memory_space<vmem>>, vector<8x128xf32>
      %22 = arith.mulf %16, %16 : vector<1x8x128xf32>
      %cst_15 = arith.constant dense<0.000000e+00> : vector<8x128xf32>
      %23 = vector.multi_reduction <add>, %22, %cst_15 [0] : vector<1x8x128xf32> to vector<8x128xf32>
      %24 = arith.addf %21, %23 : vector<8x128xf32>
      %c0_16 = arith.constant 0 : index
      %c0_17 = arith.constant 0 : index
      %25 = vector.load %arg5[%c0_16, %c0_17] : memref<8x128xf32, #tpu.memory_space<vmem>>, vector<8x128xf32>
      tpu.vector_store %arg5[%c0_16, %c0_17], %24 {strides = array<i32>} : memref<8x128xf32, #tpu.memory_space<vmem>>, vector<8x128xf32>,
    } else {
    }
    %11 = arith.extui %7 : i1 to i32
    %c0_i32_6 = arith.constant 0 : i32
    %12 = arith.cmpi ne, %11, %c0_i32_6 : i32
    scf.if %12 {
      %16 = tpu.iota {dimensions = array<i32: 0>} : vector<8x128xi32>
      %17 = tpu.iota {dimensions = array<i32: 1>} : vector<8x128xi32>
      %c128_i32 = arith.constant 128 : i32
      %18 = vector.broadcast %c128_i32 : i32 to vector<8x128xi32>
      %19 = arith.muli %16, %18 : vector<8x128xi32>
      %20 = arith.addi %19, %17 : vector<8x128xi32>
      %c16_i32 = arith.constant 16 : i32
      %21 = vector.broadcast %c16_i32 : i32 to vector<8x128xi32>
      %22 = arith.cmpi slt, %20, %21 : vector<8x128xi32>
      %cst = arith.constant 0.000000e+00 : f32
      %23 = vector.broadcast %cst : f32 to vector<8x128xf32>
      %24 = arith.select %22, %6, %23 : vector<8x128xi1>, vector<8x128xf32>
      %25 = vector.shape_cast %24 : vector<8x128xf32> to vector<1x8x128xf32>
      %c0_9 = arith.constant 0 : index
      %c0_10 = arith.constant 0 : index
      %26 = vector.load %arg4[%c0_9, %c0_10] : memref<8x128xf32, #tpu.memory_space<vmem>>, vector<8x128xf32>
      %cst_11 = arith.constant dense<0.000000e+00> : vector<8x128xf32>
      %27 = vector.multi_reduction <add>, %25, %cst_11 [0] : vector<1x8x128xf32> to vector<8x128xf32>
      %28 = arith.addf %26, %27 : vector<8x128xf32>
      %c0_12 = arith.constant 0 : index
      %c0_13 = arith.constant 0 : index
      %29 = vector.load %arg4[%c0_12, %c0_13] : memref<8x128xf32, #tpu.memory_space<vmem>>, vector<8x128xf32>
      tpu.vector_store %arg4[%c0_12, %c0_13], %28 {strides = array<i32>} : memref<8x128xf32, #tpu.memory_space<vmem>>, vector<8x128xf32>,
      %c0_14 = arith.constant 0 : index
      %c0_15 = arith.constant 0 : index
      %30 = vector.load %arg5[%c0_14, %c0_15] : memref<8x128xf32, #tpu.memory_space<vmem>>, vector<8x128xf32>
      %31 = arith.mulf %25, %25 : vector<1x8x128xf32>
      %cst_16 = arith.constant dense<0.000000e+00> : vector<8x128xf32>
      %32 = vector.multi_reduction <add>, %31, %cst_16 [0] : vector<1x8x128xf32> to vector<8x128xf32>
      %33 = arith.addf %30, %32 : vector<8x128xf32>
      %c0_17 = arith.constant 0 : index
      %c0_18 = arith.constant 0 : index
      %34 = vector.load %arg5[%c0_17, %c0_18] : memref<8x128xf32, #tpu.memory_space<vmem>>, vector<8x128xf32>
      tpu.vector_store %arg5[%c0_17, %c0_18], %33 {strides = array<i32>} : memref<8x128xf32, #tpu.memory_space<vmem>>, vector<8x128xf32>,
    } else {
    }
    %c0_i32_7 = arith.constant 0 : i32
    %13 = arith.cmpi eq, %arg0, %c0_i32_7 : i32
    %14 = arith.extui %13 : i1 to i32
    %c0_i32_8 = arith.constant 0 : i32
    %15 = arith.cmpi ne, %14, %c0_i32_8 : i32
    scf.if %15 {
      %c0_9 = arith.constant 0 : index
      %c0_10 = arith.constant 0 : index
      %16 = vector.load %arg4[%c0_9, %c0_10] : memref<8x128xf32, #tpu.memory_space<vmem>>, vector<8x128xf32>
      %17 = vector.shape_cast %16 : vector<8x128xf32> to vector<1x8x128xf32>
      %cst = arith.constant dense<0.000000e+00> : vector<1xf32>
      %18 = vector.multi_reduction <add>, %17, %cst [1, 2] : vector<1x8x128xf32> to vector<1xf32>
      %19 = vector.shape_cast %18 : vector<1xf32> to vector<1x1x1xf32>
      %20 = vector.extract %19[0, 0, 0] : f32 from vector<1x1x1xf32>
      %21 = vector.broadcast %20 : f32 to vector<1x1xf32>
      %c0_11 = arith.constant 0 : index
      %c0_12 = arith.constant 0 : index
      %22 = vector.load %arg5[%c0_11, %c0_12] : memref<8x128xf32, #tpu.memory_space<vmem>>, vector<8x128xf32>
      %23 = vector.shape_cast %22 : vector<8x128xf32> to vector<1x8x128xf32>
      %cst_13 = arith.constant dense<0.000000e+00> : vector<1xf32>
      %24 = vector.multi_reduction <add>, %23, %cst_13 [1, 2] : vector<1x8x128xf32> to vector<1xf32>
      %25 = vector.shape_cast %24 : vector<1xf32> to vector<1x1x1xf32>
      %26 = vector.extract %25[0, 0, 0] : f32 from vector<1x1x1xf32>
      %27 = vector.broadcast %26 : f32 to vector<1x1xf32>
      %c0_14 = arith.constant 0 : index
      %c0_15 = arith.constant 0 : index
      %28 = vector.load %arg6[%c0_14, %c0_15] : memref<1x1xf32, #tpu.memory_space<vmem>>, vector<1x1xf32>
      %cst_16 = arith.constant 6.250000e-02 : f32
      %29 = vector.broadcast %cst_16 : f32 to vector<1x1xf32>
      %30 = arith.mulf %21, %29 : vector<1x1xf32>
      %31 = arith.addf %28, %30 : vector<1x1xf32>
      %32 = arith.mulf %21, %21 : vector<1x1xf32>
      %cst_17 = arith.constant 6.250000e-02 : f32
      %33 = vector.broadcast %cst_17 : f32 to vector<1x1xf32>
      %34 = arith.mulf %32, %33 : vector<1x1xf32>
      %35 = arith.subf %27, %34 : vector<1x1xf32>
      %cst_18 = arith.constant 0.0666666701 : f32
      %36 = vector.broadcast %cst_18 : f32 to vector<1x1xf32>
      %37 = arith.mulf %35, %36 : vector<1x1xf32>
      %cst_19 = arith.constant 0.000000e+00 : f32
      %38 = vector.broadcast %cst_19 : f32 to vector<1x1xf32>
      %39 = arith.maximumf %37, %38 : vector<1x1xf32>
      %40 = math.sqrt %39 : vector<1x1xf32>
      %c0_20 = arith.constant 0 : index
      %c0_21 = arith.constant 0 : index
      %41 = memref.load %arg1[%c0_20, %c0_21] : memref<1x1xf32, #tpu.memory_space<smem>>
      %cst_22 = arith.constant -5.000000e+00 : f32
      %cst_23 = arith.constant 5.000000e+00 : f32
      %42 = arith.maximumf %cst_22, %41 : f32
      %43 = arith.minimumf %cst_23, %42 : f32
      %44 = vector.broadcast %43 : f32 to vector<1x1xf32>
      %45 = arith.mulf %44, %40 : vector<1x1xf32>
      %46 = arith.addf %31, %45 : vector<1x1xf32>
      %cst_24 = arith.constant 0.000000e+00 : f32
      %47 = vector.broadcast %cst_24 : f32 to vector<1x1xf32>
      %48 = arith.maximumf %46, %47 : vector<1x1xf32>
      %c0_25 = arith.constant 0 : index
      %c0_26 = arith.constant 0 : index
      %49 = vector.load %arg3[%c0_25, %c0_26] : memref<1x1xf32, #tpu.memory_space<vmem>>, vector<1x1xf32>
      tpu.vector_store %arg3[%c0_25, %c0_26], %48 {strides = array<i32>} : memref<1x1xf32, #tpu.memory_space<vmem>>, vector<1x1xf32>,
    } else {
    }
    return
  }
  func.func @transform_0(%arg0: i32) -> (i32, i32) {
    %c0_i32 = arith.constant 0 : i32
    %c0_i32_0 = arith.constant 0 : i32
    %c0_i32_1 = arith.constant 0 : i32
    return %c0_i32, %c0_i32_0 : i32, i32
  }
  func.func @transform_1(%arg0: i32) -> (i32, i32) {
    %c0_i32 = arith.constant 0 : i32
    %c0_i32_0 = arith.constant 0 : i32
    return %arg0, %c0_i32 : i32, i32
  }
  func.func @transform_2(%arg0: i32) -> (i32, i32) {
    %c0_i32 = arith.constant 0 : i32
    %c0_i32_0 = arith.constant 0 : i32
    %c0_i32_1 = arith.constant 0 : i32
    return %c0_i32, %c0_i32_0 : i32, i32
  }
}

</mosaic_0001>

<bundles_post_ra>
// kernel: fftnn_forward.3
= control target key start
LH: loop header
LB: loop body
LE: loop exit
PB: predicated region body
PF: predicated region fallthrough
CT: control target
= control target key end

     0   :  { %v23_v2 = vmov 0.0   ;;  %s48_s0 = inlined_call_operand.<no memory space> [shape: f32[1,1], index: 0, kind: input, shape index: {}]   ;;  %s49_s1 = inlined_call_operand.vmem [shape: f32[8,128], index: 1, kind: input, shape index: {}]   ;;  %s50_s2 = inlined_call_operand.vmem [shape: f32[8,128], index: 2, kind: output, shape index: {}]  }
   0x1   :  { %v13_v0 = vld [vmem:[%s49_s1] sm:$0xff]  ;;  %v14_v1 = vstv %s48_s0 }
   0x2   :  { %vm15_vm0 = vcmp.gt.f32.partialorder %v13_v0, %v14_v1 }
   0x3   :  { %v16_v3 = vsel %vm15_vm0, 1.0, %v23_v2 }
   0x4   :  { %17 = vst [vmem:[%s50_s2] sm:$0xff] %v16_v3 }

// kernel: fftnn_forward.2
= control target key start
LH: loop header
LB: loop body
LE: loop exit
PB: predicated region body
PF: predicated region fallthrough
CT: control target
= control target key end

     0   :  { %vm18_vm0 = vcmask 0   ;;  %v163_v1 = vmov 0   ;;  %s205_s0 = inlined_call_operand.<no memory space> [shape: f32[1,1], index: 0, kind: input, shape index: {}]   ;;  %s206_s1 = inlined_call_operand.vmem [shape: f32[8,128], index: 1, kind: input, shape index: {}]   ;;  %s207_s2 = inlined_call_operand.hbm [shape: f32[1,1], index: 2, kind: output, shape index: {}]  }
   0x1   :  { %v17_v0 = vld [vmem:[%s206_s1] sm:$0x1]  ;;  %136 = vset.pattern.permute.xlu0 %v163_v1 }
   0x2   :  { %19 = vst.msk [vmem:[#allocation4] sm:$0x1] %vm18_vm0, %v17_v0 }
   0x3   :  { %8 = vsyncpa [#allocation7], 0  ;;  %v50_v3 = vlaneseq  ;;  %v22_v8 = vld [vmem:[%s206_s1] sm:$0xff]  ;;  %s164_s14 = smov -5.0   ;;  %s165_s18 = smov 5.0  }
   0x4   :  { %s105_s17 = smax.f32 %s164_s14, %s205_s0  ;;  %s166_s20 = smov [#allocation6]  }
   0x5   :  { %v51_v4 = vshrl.u32 %v50_v3, 7  ;;  %v53_v5 = vand.u32 127, %v50_v3  ;;  %s106_s19 = smin.f32 %s165_s18, %s105_s17  ;;  %s119_s21 = sshll.u32 %s166_s20, 4  ;;  %s120_s21 = int_to_ptr.vmem [resolvable:$true] %s119_s21 }
   0x6   :  { %v107_v39 = vstv %s106_s19  ;;  %s139_s0 = scalar_lea.vmem %s120_s21, 16  ;;  %s143_s22 = scalar_lea.vmem %s120_s21, 32 }
   0x7   :  { %v54_v6 = vmul.u32 128, %v51_v4  ;;  %p140_p0 = scmp.ne.s32.totalorder %s120_s21, %s139_s0  ;;  %p144_p1 = scmp.lt.s32.totalorder %s120_s21, %s120_s21 }
   0x8   :  { %p145_p2 = scmp.lt.s32.totalorder %s143_s22, %s139_s0 }
   0x9   :  { %v127_v2 = vld [vmem:[#allocation4] ss:$0 sm:$0xff]  ;;  %v55_v7 = vadd.s32 %v54_v6, %v53_v5 }
   0xa   :  { %30 = vperm.xlu0 %136, %v127_v2   ;;  %v89_v37 = vld [vmem:[#allocation4] sm:$0x1]  ;;  %p146_p3 = por %p145_p2, %p144_p1 }
   0xb   :  { %vm56_vm1 = vcmp.lt.s32.totalorder %v55_v7, 16 }
   0xc   :  { %p147_p4 = pnand %p146_p3, %p140_p0 }
  0x89   :  { %v31_v9 = vpop.permute.xlu0 %30 }
  0x8a   :  { %v33_v10 = vsub.f32 %v22_v8, %v31_v9 }
  0x8c   :  { %v57_v11 = vsel %vm56_vm1, %v33_v10, 0.0 }
  0x8d   :  { %68 = vadd.xlane.f32.xlu0 %v57_v11  ;;  %v63_v12 = vmul.f32 %v57_v11, %v57_v11 }
  0x8f   :  { %79 = vadd.xlane.f32.xlu1 %v63_v12 }
 0x11a   :  { %v69_v13 = vpop.xlane.xlu0 %68 }
 0x11b   :  { %v70_v14 = vrot.slane %v69_v13, 4 }
 0x11c   :  { %v80_v15 = vpop.xlane.xlu1 %79 }
 0x11d   :  { %v71_v16 = vadd.f32 %v70_v14, %v69_v13  ;;  %v81_v17 = vrot.slane %v80_v15, 4 }
 0x11f   :  { %v72_v18 = vrot.slane %v71_v16, 2  ;;  %v82_v19 = vadd.f32 %v81_v17, %v80_v15 }
 0x121   :  { %v83_v20 = vrot.slane %v82_v19, 2  ;;  %v73_v21 = vadd.f32 %v72_v18, %v71_v16 }
 0x123   :  { %v84_v22 = vadd.f32 %v83_v20, %v82_v19  ;;  %v74_v23 = vrot.slane %v73_v21, 1 }
 0x125   :  { %v75_v24 = vadd.f32 %v74_v23, %v73_v21  ;;  %v85_v25 = vrot.slane %v84_v22, 1 }
 0x127   :  { %128 = vpush %v75_v24  ;;  %v86_v26 = vadd.f32 %v85_v25, %v84_v22 }
 0x129   :  { %130 = vpush %v86_v26 }
 0x158   :  { %s129_s1 = spop %128 }
 0x159   :  { %v77_v27 = vstv %s129_s1 }
 0x15a   :  { %v92_v28 = vmul.f32 %v77_v27, %v77_v27  ;;  %s131_s13 = spop %130  ;;  %v90_v35 = vmul.f32 0.0625, %v77_v27 }
 0x15b   :  { %v88_v30 = vstv %s131_s13 }
 0x15c   :  { %v93_v29 = vmul.f32 0.0625, %v92_v28  ;;  %v91_v42 = vadd.f32 %v90_v35, %v89_v37 }
 0x15e   :  { %v94_v31 = vsub.f32 %v88_v30, %v93_v29 }
 0x160   :  { %v95_v32 = vmul.f32 0.06666667, %v94_v31 }
 0x162   :  { %v96_v33 = vmax.f32 %v95_v32, 0.0 }
 0x164   :  { %137 = vrsqrt.f32 %v96_v33  ;;  %vm99_vm2 = vcmp.eq.f32.partialorder %v96_v33, inf  ;;  %v102_v38 = vand.u32 2147483648, %v96_v33  ;;  %vm101_vm3 = vcmp.eq.f32.partialorder %v96_v33, 0.0 }
 0x16e   :  { %v138_v34 = vpop.eup %137 }
 0x16f   :  { %v98_v36 = vmul.f32 %v138_v34, %v96_v33 }
 0x171   :  { %v100_v40 = vsel %vm99_vm2, %v96_v33, %v98_v36 }
 0x172   :  { %v103_v41 = vsel %vm101_vm3, %v102_v38, %v100_v40 }
 0x173   :  { %v108_v43 = vmul.f32 %v107_v39, %v103_v41 }
 0x175   :  { %v109_v44 = vadd.f32 %v108_v43, %v91_v42 }
 0x177   :  { %v110_v45 = vmax.f32 %v109_v44, 0.0 }
 0x179   :  { %112 = vst.msk [vmem:[#allocation6] sm:$0x1] %vm18_vm0, %v110_v45 }
 0x17a   :  { %150 = shalt.err (!%p147_p4)
}
 0x17b   :  { %s151_s25 = scalar_lea.hbm %s207_s2, 16 }
 0x17c   :  { %p152_p5 = scmp.ne.s32.totalorder %s207_s2, %s151_s25  ;;  %p155_p6 = scmp.lt.u32.totalorder %s151_s25, %s207_s2 }
 0x17e   :  { %p157_p7 = pnand %p155_p6, %p152_p5 }
 0x180   :  { %160 = shalt.err (!%p157_p7)
}
 0x181   :  { %122 = dma.vmem_to_hbm [thread:$0]  %s120_s21, 16, %s207_s2, [#allocation7]  }
 0x182   :  { %161 = dma.done.wait [#allocation7], 16  }
 0x183   :  { %162 = vsyncadd [#allocation7], 4294967280 }
 0x184   :  { %126 = vsyncpa [#allocation7], 1 }

</bundles_post_ra>
